<compile_context>
chip_gen: v5e
topology: v5e:2x2
jax: 0.10.0
libtpu: 0.0.40
codegen_flags: <defaults>
</compile_context>

<pallas_src>
import math

import jax
import jax.numpy as jnp
import numpy as np
from jax.experimental import pallas as pl
from jax.experimental.pallas import tpu as pltpu


def _ceil_to(a, m):
    return -(-a // m) * m


# ----------------------------------------------------------------------------
# Pallas kernel: one (TM, TN) output tile of  normalize(x) @ normalize(w).T
# Normalization is applied as an output scale (rinv_x outer rinv_w), so the
# per-tile work is just a bf16 MXU matmul + one cheap VPU scaling pass.
# ----------------------------------------------------------------------------
def _partial_fc_kernel(x_ref, w_ref, rx_ref, rw_ref, o_ref):
    x = x_ref[...].astype(jnp.bfloat16)           # [TM, D]  bf16 -> full MXU rate
    w = w_ref[...].astype(jnp.bfloat16)           # [TN, D]
    raw = jax.lax.dot_general(                    # [TM, TN] f32 accumulation
        x, w,
        dimension_numbers=(((1,), (1,)), ((), ())),
        preferred_element_type=jnp.float32,
    )
    # Fold L2 normalization of both operands into the output tile.
    o_ref[...] = raw * rx_ref[...] * rw_ref[...]  # (TM,1) and (1,TN) broadcasts


# ----------------------------------------------------------------------------
# Wrapper: padded gather of the sampled class rows + reciprocal norms + kernel
# ----------------------------------------------------------------------------
def partial_fc_logits(x, weights, class_idx, *, tm_max=256, tn_max=512):
    """normalize(x) @ normalize(weights[class_idx]).T on TPU.

    x:         [B, D] float embeddings
    weights:   [C, D] full class-weight table
    class_idx: [K]    int32 sampled class ids (positives ++ negatives)
    returns    [B, K] float32 cosine logits
    """
    B, D = x.shape
    K = int(class_idx.shape[0])

    # ---- tile sizes: multiples of (8, 128), safe for v5e/v6e/v7x VMEM ----
    B8 = _ceil_to(B, 8)
    TM = min(tm_max, B8)
    B_pad = _ceil_to(B, TM)
    K128 = _ceil_to(K, 128)
    TN = min(tn_max, K128)
    K_pad = _ceil_to(K, TN)

    # Pad the (tiny) index vector, then gather ONCE into the padded [K_pad, D]
    # buffer.  Padded rows duplicate class 0; their logit columns are sliced
    # away below, so no separate concat/zero-pad HBM pass is needed.
    # TODO(synk): fuse this gather into the kernel (scalar-prefetched indices +
    # manual DMA row gather) to remove one K*D HBM pass.
    idx_p = jnp.zeros((K_pad,), jnp.int32).at[:K].set(class_idx.astype(jnp.int32))
    w_p = weights[idx_p]                                            # [K_pad, D]

    x_p = x if B_pad == B else jnp.zeros((B_pad, D), x.dtype).at[:B].set(x)

    # Reciprocal L2 norms, computed once (torch normalize: v / max(||v||, eps)).
    # Clamp the SQUARED norm with eps^2 so zero (padded) rows map to 0 exactly.
    eps2 = jnp.float32(1e-12) ** 2
    rinv_x = jax.lax.rsqrt(jnp.maximum(
        jnp.sum(x_p.astype(jnp.float32) ** 2, axis=-1, keepdims=True), eps2))   # [B_pad, 1]
    rinv_w = jax.lax.rsqrt(jnp.maximum(
        jnp.sum(w_p.astype(jnp.float32) ** 2, axis=-1), eps2))[None, :]          # [1, K_pad]

    grid = (B_pad // TM, K_pad // TN)
    bytes_accessed = 4 * (x_p.size + w_p.size + rinv_x.size + rinv_w.size
                          + B_pad * K_pad)

    out = pl.pallas_call(
        _partial_fc_kernel,
        out_shape=jax.ShapeDtypeStruct((B_pad, K_pad), jnp.float32),
        grid=grid,
        in_specs=[
            pl.BlockSpec((TM, D), lambda i, j: (i, 0)),   # x tile (reused over j)
            pl.BlockSpec((TN, D), lambda i, j: (j, 0)),   # w tile
            pl.BlockSpec((TM, 1), lambda i, j: (i, 0)),   # 1/||x|| rows
            pl.BlockSpec((1, TN), lambda i, j: (0, j)),   # 1/||w|| cols
        ],
        out_specs=pl.BlockSpec((TM, TN), lambda i, j: (i, j)),
        compiler_params=pltpu.CompilerParams(
            dimension_semantics=("parallel", "parallel")),
        cost_estimate=pl.CostEstimate(
            flops=2 * B_pad * K_pad * D,
            transcendentals=0,
            bytes_accessed=bytes_accessed),
    )(x_p, w_p, rinv_x, rinv_w)

    return out[:B, :K]


# ----------------------------------------------------------------------------
# Full PartialFC forward (data-dependent glue in plain JAX, hot path in Pallas)
# ----------------------------------------------------------------------------
def partial_fc_forward(weights, x, y, num_classes, sample_ratio, sample_key):
    # positive = sorted unique labels in the batch (data-dependent size, so it
    # runs eagerly like the PyTorch reference).
    # TODO(synk): a shape-static variant (jnp.unique(size=B) + fixed num_sample)
    # would allow jitting the whole forward, but changes the module's
    # data-dependent logits width.
    positive = jnp.unique(y)
    n = int(positive.shape[0])

    # label remapping: remap_y[b] = position of y[b] within `positive`, else -1
    idx_map = jnp.full((num_classes,), -1, dtype=jnp.int32)
    idx_map = idx_map.at[positive].set(jnp.arange(n, dtype=jnp.int32))
    remap_y = idx_map[y]

    # negative sampling: top-k of uniform noise with positives masked to -1
    num_sample = max(math.ceil(sample_ratio * num_classes) - n, n * 2)
    perm = jax.random.uniform(sample_key, (num_classes,), dtype=jnp.float32)
    perm = perm.at[positive].set(-1.0)
    _, negative = jax.lax.top_k(perm, num_sample)     # sorted by value desc

    class_idx = jnp.concatenate(
        [positive.astype(jnp.int32), negative.astype(jnp.int32)])

    # hot path: fused (normalize @ normalize.T) in the Pallas kernel
    logits = partial_fc_logits(x, weights, class_idx)
    return logits, remap_y


if __name__ == "__main__":
    num_classes = 64
    embed_dim = 32
    sample_ratio = 0.1
    batch = 8

    key = jax.random.PRNGKey(0)
    k_w, k_x, k_y, k_perm = jax.random.split(key, 4)

    # nn.Embedding default init: N(0, 1)
    weights = jax.random.normal(k_w, (num_classes, embed_dim), dtype=jnp.float32)
    x = jax.random.normal(k_x, (batch, embed_dim), dtype=jnp.float32)
    y = jax.random.randint(k_y, (batch,), 0, num_classes, dtype=jnp.int32)

    logits, remap_y = partial_fc_forward(
        weights, x, y, num_classes, sample_ratio, k_perm)
    logits = jax.block_until_ready(logits)
    remap_y = jax.block_until_ready(remap_y)

    # ---- reference check of the kernelized hot path (numpy, full precision) ----
    positive = jnp.unique(y)
    n = int(positive.shape[0])
    num_sample = max(math.ceil(sample_ratio * num_classes) - n, n * 2)
    perm = jax.random.uniform(k_perm, (num_classes,), dtype=jnp.float32)
    perm = perm.at[positive].set(-1.0)
    _, negative = jax.lax.top_k(perm, num_sample)
    class_idx = np.concatenate([np.asarray(positive), np.asarray(negative)])

    w_np = np.asarray(weights)[class_idx]
    x_np = np.asarray(x)

    def _l2n(v):
        return v / np.maximum(
            np.sqrt(np.sum(v * v, axis=-1, keepdims=True)), 1e-12)

    ref_logits = _l2n(x_np) @ _l2n(w_np).T

    assert logits.shape == (batch, n + num_sample), logits.shape
    assert remap_y.shape == (batch,), remap_y.shape
    # bf16 MXU operands with f32 accumulation: loosen tolerance accordingly
    np.testing.assert_allclose(np.asarray(logits), ref_logits,
                               rtol=2e-2, atol=2e-2)

    print("KERNEL_OK")
</pallas_src>

<mosaic_0001>
module attributes {stable_mosaic.version = 11 : i64} {
  func.func @_partial_fc_kernel(%arg0: i32, %arg1: i32, %arg2: memref<8x32xf32, #tpu.memory_space<vmem>>, %arg3: memref<128x32xf32, #tpu.memory_space<vmem>>, %arg4: memref<8x1xf32, #tpu.memory_space<vmem>>, %arg5: memref<1x128xf32, #tpu.memory_space<vmem>>, %arg6: memref<8x128xf32, #tpu.memory_space<vmem>>) attributes {dimension_semantics = [#tpu.dimension_semantics<parallel>, #tpu.dimension_semantics<parallel>], iteration_bounds = array<i64: 1, 1>, scalar_prefetch = 0 : i64, scratch_operands = 0 : i64, tpu.core_type = #tpu.core_type<tc>, window_params = [{transform_indices = @transform_0, window_bounds = array<i64: 8, 32>}, {transform_indices = @transform_1, window_bounds = array<i64: 128, 32>}, {transform_indices = @transform_2, window_bounds = array<i64: 8, 1>}, {transform_indices = @transform_3, window_bounds = array<i64: 1, 128>}, {transform_indices = @transform_4, window_bounds = array<i64: 8, 128>}]} {
    %c0 = arith.constant 0 : index
    %c0_0 = arith.constant 0 : index
    %0 = vector.load %arg2[%c0, %c0_0] : memref<8x32xf32, #tpu.memory_space<vmem>>, vector<8x32xf32>
    %1 = arith.truncf %0 : vector<8x32xf32> to vector<8x32xbf16>
    %c0_1 = arith.constant 0 : index
    %c0_2 = arith.constant 0 : index
    %2 = vector.load %arg3[%c0_1, %c0_2] : memref<128x32xf32, #tpu.memory_space<vmem>>, vector<128x32xf32>
    %3 = arith.truncf %2 : vector<128x32xf32> to vector<128x32xbf16>
    %cst = arith.constant dense<0.000000e+00> : vector<8x128xf32>
    %4 = tpu.matmul %1, %3, %cst {dimension_numbers = #tpu.dot_dimension_numbers<[1], [1], [0], [0], [0, 0, 1, 0], [], []>} : vector<8x32xbf16>, vector<128x32xbf16>, vector<8x128xf32> -> vector<8x128xf32>
    %c0_3 = arith.constant 0 : index
    %c0_4 = arith.constant 0 : index
    %5 = vector.load %arg4[%c0_3, %c0_4] : memref<8x1xf32, #tpu.memory_space<vmem>>, vector<8x1xf32>
    %6 = vector.broadcast %5 : vector<8x1xf32> to vector<8x128xf32>
    %7 = arith.mulf %4, %6 : vector<8x128xf32>
    %c0_5 = arith.constant 0 : index
    %c0_6 = arith.constant 0 : index
    %8 = vector.load %arg5[%c0_5, %c0_6] : memref<1x128xf32, #tpu.memory_space<vmem>>, vector<1x128xf32>
    %9 = vector.broadcast %8 : vector<1x128xf32> to vector<8x128xf32>
    %10 = arith.mulf %7, %9 : vector<8x128xf32>
    %c0_7 = arith.constant 0 : index
    %c0_8 = arith.constant 0 : index
    %11 = vector.load %arg6[%c0_7, %c0_8] : memref<8x128xf32, #tpu.memory_space<vmem>>, vector<8x128xf32>
    tpu.vector_store %arg6[%c0_7, %c0_8], %10 {strides = array<i32>} : memref<8x128xf32, #tpu.memory_space<vmem>>, vector<8x128xf32>,
    return
  }
  func.func @transform_0(%arg0: i32, %arg1: i32) -> (i32, i32) {
    %c0_i32 = arith.constant 0 : i32
    %c0_i32_0 = arith.constant 0 : i32
    return %arg0, %c0_i32 : i32, i32
  }
  func.func @transform_1(%arg0: i32, %arg1: i32) -> (i32, i32) {
    %c0_i32 = arith.constant 0 : i32
    %c0_i32_0 = arith.constant 0 : i32
    return %arg1, %c0_i32 : i32, i32
  }
  func.func @transform_2(%arg0: i32, %arg1: i32) -> (i32, i32) {
    %c0_i32 = arith.constant 0 : i32
    %c0_i32_0 = arith.constant 0 : i32
    return %arg0, %c0_i32 : i32, i32
  }
  func.func @transform_3(%arg0: i32, %arg1: i32) -> (i32, i32) {
    %c0_i32 = arith.constant 0 : i32
    %c0_i32_0 = arith.constant 0 : i32
    return %c0_i32, %arg1 : i32, i32
  }
  func.func @transform_4(%arg0: i32, %arg1: i32) -> (i32, i32) {
    %c0_i32 = arith.constant 0 : i32
    return %arg0, %arg1 : i32, i32
  }
}

</mosaic_0001>

<bundles_post_ra>
// kernel: tpu_custom_call.1
= control target key start
LH: loop header
LB: loop body
LE: loop exit
PB: predicated region body
PF: predicated region fallthrough
CT: control target
= control target key end

     0   :  { %vm44_vm0 = vcmask 261120   ;;  %s241_s0 = inlined_call_operand.vmem [shape: f32[8,32], index: 0, kind: input, shape index: {}]   ;;  %s242_s1 = inlined_call_operand.vmem [shape: f32[128,32], index: 1, kind: input, shape index: {}]   ;;  %s243_s2 = inlined_call_operand.vmem [shape: f32[8,1], index: 2, kind: input, shape index: {}]   ;;  %s244_s3 = inlined_call_operand.vmem [shape: f32[1,128], index: 3, kind: input, shape index: {}]   ;;  %s245_s4 = inlined_call_operand.hbm [shape: f32[8,128], index: 4, kind: output, shape index: {}]  }
   0x1   :  { %v34_v0 = vld [vmem:[%s242_s1 + $0x70] sm:$0xff]  ;;  %v35_v1 = vld [vmem:[%s242_s1 + $0x78] sm:$0xff]  ;;  %v32_v3 = vld [vmem:[%s242_s1 + $0x60] sm:$0xff] }
   0x2   :  { %v43_v2 = vpack.c.bf16 %v35_v1, %v34_v0  ;;  %v33_v4 = vld [vmem:[%s242_s1 + $0x68] sm:$0xff] }
   0x4   :  { %v70_v5 = vsel %vm44_vm0, %v43_v2, 0 }
   0x5   :  { %9 = vsyncpa [#allocation3], 0  ;;  %72 = vmatpush.bf16.xpose.msra.mxu0 %v70_v5  ;;  %v42_v6 = vpack.c.bf16 %v33_v4, %v32_v3  ;;  %v30_v8 = vld [vmem:[%s242_s1 + $0x50] sm:$0xff]  ;;  %v31_v9 = vld [vmem:[%s242_s1 + $0x58] sm:$0xff]  ;;  %v145_v23 = vmov 0   ;;  %s146_s26 = smov [#allocation2]  }
   0x6   :  { %v41_v10 = vpack.c.bf16 %v31_v9, %v30_v8  ;;  %v28_v12 = vld [vmem:[%s242_s1 + $0x40] sm:$0xff]  ;;  %v29_v13 = vld [vmem:[%s242_s1 + $0x48] sm:$0xff]  ;;  %v26_v16 = vld [vmem:[%s242_s1 + $0x30] sm:$0xff]  ;;  %117 = vset.pattern.permute.xlu0 %v145_v23  ;;  %s105_s29 = sshll.u32 %s245_s4, 4  ;;  %s106_s29 = int_to_ptr.hbm [resolvable:$true] %s105_s29 }
   0x7   :  { %v67_v7 = vsel %vm44_vm0, %v42_v6, 0  ;;  %v40_v14 = vpack.c.bf16 %v29_v13, %v28_v12  ;;  %v27_v17 = vld [vmem:[%s242_s1 + $0x38] sm:$0xff]  ;;  %v24_v20 = vld [vmem:[%s242_s1 + $0x20] sm:$0xff]  ;;  %v25_v21 = vld [vmem:[%s242_s1 + $0x28] sm:$0xff] }
   0x8   :  { %v64_v11 = vsel %vm44_vm0, %v41_v10, 0  ;;  %v39_v18 = vpack.c.bf16 %v27_v17, %v26_v16  ;;  %v85_v22 = vld [vmem:[%s243_s2] sm:$0xff]  ;;  %v38_v24 = vpack.c.bf16 %v25_v21, %v24_v20  ;;  %v22_v26 = vld [vmem:[%s242_s1 + $0x10] sm:$0xff]  ;;  %v23_v27 = vld [vmem:[%s242_s1 + $0x18] sm:$0xff] }
   0x9   :  { %v61_v15 = vsel %vm44_vm0, %v40_v14, 0  ;;  %88 = vperm.xlu0 %117, %v85_v22   ;;  %v37_v28 = vpack.c.bf16 %v23_v27, %v22_v26  ;;  %v20_v30 = vld [vmem:[%s242_s1] sm:$0xff]  ;;  %v21_v31 = vld [vmem:[%s242_s1 + $0x8] sm:$0xff]  ;;  %s103_s1 = sshll.u32 %s146_s26, 4  ;;  %s104_s1 = int_to_ptr.vmem [resolvable:$true] %s103_s1 }
   0xa   :  { %v58_v19 = vsel %vm44_vm0, %v39_v18, 0  ;;  %v55_v25 = vsel %vm44_vm0, %v38_v24, 0  ;;  %v36_v32 = vpack.c.bf16 %v21_v31, %v20_v30  ;;  %v18_v34 = vld [vmem:[%s241_s0] sm:$0xff] }
   0xb   :  { %v52_v29 = vsel %vm44_vm0, %v37_v28, 0  ;;  %v19_v35 = vpack.c.bf16 %v18_v34, %v18_v34  ;;  %v118_v37 = vld [vmem:[%s244_s3] ss:$0 sm:$0xff] }
   0xc   :  { %v49_v33 = vsel %vm44_vm0, %v36_v32, 0 }
   0xd   :  { %73 = vmatpush.bf16.xpose.msra.mxu0 %v67_v7 }
  0x15   :  { %74 = vmatpush.bf16.xpose.msra.mxu0 %v64_v11 }
  0x1d   :  { %75 = vmatpush.bf16.xpose.msra.mxu0 %v61_v15 }
  0x25   :  { %76 = vmatpush.bf16.xpose.msra.mxu0 %v58_v19 }
  0x2d   :  { %77 = vmatpush.bf16.xpose.msra.mxu0 %v55_v25 }
  0x35   :  { %78 = vmatpush.bf16.xpose.msra.mxu0 %v52_v29 }
  0x3d   :  { %79 = vmatpush.bf16.xpose.msra.mxu0 %v49_v33 }
  0x44   :  { %114 = vmatmul.msk.bf16.vlgmr.msra.gmra.mxu0 %vm44_vm0, %v19_v35 }
  0x7b   :  { %v89_v36 = vpop.permute.xlu0 %88 }
  0xc1   :  { %v81_v38 = vpop.f32.mrf.mxu0 }
  0xc2   :  { %v91_v39 = vmul.f32 %v89_v36, %v81_v38 }
  0xc4   :  { %v96_v40 = vmul.f32 %v118_v37, %v91_v39 }
  0xc6   :  { %97 = vst [vmem:[#allocation2] sm:$0xff] %v96_v40 }
  0xc7   :  { %108 = dma.vmem_to_hbm [thread:$0]  %s104_s1, 128, %s106_s29, [#allocation3]  }
  0xc9   :  { %v83_v41 = vpop.f32.mrf.mxu0 }
  0xca   :  { %143 = dma.done.wait [#allocation3], 128  }
  0xcb   :  { %144 = vsyncadd [#allocation3], 4294967168 }
  0xcc   :  { %113 = vsyncpa [#allocation3], 1 }

</bundles_post_ra>
